<compile_context>
chip_gen: v6e
topology: v6e:2x2x1
jax: 0.10.0
libtpu: 0.0.40
codegen_flags: <defaults>
</compile_context>

<pallas_src>
import jax
import jax.numpy as jnp
from jax.experimental import pallas as pl
from jax.experimental.pallas import tpu as pltpu

LANE = 128      # vreg lane width
SUBLANE = 8     # f32 sublane height: batch tiles are multiples of this


def _round_up(x, m):
    return (x + m - 1) // m * m


# ----------------------------------------------------------------------------
# Pallas kernel: one AffineCoupling forward for one batch tile.
# Emits torch.cat([x1, z2], dim=1) via two direct sub-stores.
# ----------------------------------------------------------------------------
def _affine_coupling_kernel(x_ref, mask_ref, w1_ref, b1_ref, w2_ref, b2_ref,
                            w3_ref, b3_ref, out_ref):
    x = x_ref[...]                       # (TB, D) f32
    m = mask_ref[...]                    # (1, D)  f32, broadcast over batch
    D = x.shape[-1]

    x1 = x * m                           # mask * x
    x2 = x * (1.0 - m)                   # (1 - mask) * x

    # net(x1) = Linear -> Tanh -> Linear -> Tanh -> Linear.
    # Weights may be bf16 (lane-aligned sizes) or f32 (small demo sizes);
    # each matmul input is cast to the weight dtype exactly once,
    # accumulation and all transcendentals stay f32.
    wdt = w1_ref.dtype
    h = jnp.dot(x1.astype(wdt), w1_ref[...],
                preferred_element_type=jnp.float32) + b1_ref[...]
    h = jnp.tanh(h)
    h = jnp.dot(h.astype(wdt), w2_ref[...],
                preferred_element_type=jnp.float32) + b2_ref[...]
    h = jnp.tanh(h)
    t = jnp.dot(h.astype(wdt), w3_ref[...],
                preferred_element_type=jnp.float32) + b3_ref[...]

    # scale_fn_example: tanh(x) * 0.5 + 0.5
    s = jnp.tanh(t) * 0.5 + 0.5
    # z2 = x2 * exp(s) + net(x1)
    z2 = x2 * jnp.exp(s) + t

    # torch.cat([x1, z2], dim=1): two sub-stores, no (TB, 2*D) temporary.
    out_ref[:, 0:D] = x1.astype(out_ref.dtype)
    out_ref[:, D:2 * D] = z2.astype(out_ref.dtype)


def affine_coupling_forward(x, params, *, tb=512):
    """One coupling layer: x (B, D) -> cat([x1, z2], dim=1) of shape (B, 2D)."""
    mask, w1, b1, w2, b2, w3, b3 = params
    B, D = x.shape
    H = w1.shape[1]

    # ---- batch tiling --------------------------------------------------
    bp8 = _round_up(B, SUBLANE)
    desired = max(SUBLANE, min(_round_up(tb, SUBLANE), bp8))
    # v7x: enforce >= 2 grid steps whenever there is more than one sublane
    # tile of rows, so ("parallel",) can shard the batch over both
    # TensorCores (free on v5e/v6e -- the single TC just iterates).
    min_steps = 2 if bp8 > SUBLANE else 1
    grid_n = max(min_steps, pl.cdiv(bp8, desired))
    tb_eff = _round_up(pl.cdiv(bp8, grid_n), SUBLANE)
    grid_n = max(min_steps, pl.cdiv(bp8, tb_eff))
    Bp = grid_n * tb_eff

    # Pad only the batch, and only when actually needed (skip the extra XLA
    # copy for already-aligned batches).
    x_in = x if Bp == B else jnp.pad(x, ((0, Bp - B), (0, 0)))

    def const_spec(shape):
        # Grid-invariant operand: single-buffered -- its block index never
        # changes across grid steps, so double-buffering would waste VMEM.
        return pl.BlockSpec(shape, lambda i: (0, 0),
                            pipeline_mode=pl.Buffered(1))

    # ---- explicit per-step VMEM budget (review: v7x has only 64 MiB) ----
    w_itemsize = jnp.dtype(w1.dtype).itemsize
    w_bytes = w_itemsize * (D * H + H * H + H * D)
    b_bytes = 4 * (2 * H + 2 * D)                 # b1, b2, b3 and mask
    x_tile = tb_eff * D * 4
    out_tile = tb_eff * 2 * D * 4
    vmem_need = 2 * (x_tile + out_tile) + w_bytes + b_bytes   # dbl-buf streams
    vmem_limit = int(min(max(4 * vmem_need + (8 << 20), 16 << 20), 48 << 20))

    cost = pl.CostEstimate(
        flops=2 * Bp * (D * H + H * H + H * D),
        transcendentals=Bp * (2 * H + 2 * D),     # 2x tanh(H), tanh(D), exp(D)
        bytes_accessed=Bp * D * 4 + Bp * 2 * D * 4 + w_bytes + b_bytes,
    )

    out = pl.pallas_call(
        _affine_coupling_kernel,
        out_shape=jax.ShapeDtypeStruct((Bp, 2 * D), x.dtype),
        grid=(grid_n,),
        in_specs=[
            pl.BlockSpec((tb_eff, D), lambda i: (i, 0)),   # x, tiled on batch
            const_spec((1, D)),    # mask
            const_spec((D, H)),    # W1
            const_spec((1, H)),    # b1
            const_spec((H, H)),    # W2
            const_spec((1, H)),    # b2
            const_spec((H, D)),    # W3
            const_spec((1, D)),    # b3
        ],
        out_specs=pl.BlockSpec((tb_eff, 2 * D), lambda i: (i, 0)),
        compiler_params=pltpu.CompilerParams(
            dimension_semantics=("parallel",),
            vmem_limit_bytes=vmem_limit,
        ),
        cost_estimate=cost,
    )(x_in, mask, w1, b1, w2, b2, w3, b3)

    return out if Bp == B else out[:B]


# Pure-JAX reference of the same coupling layer (same weight dtype, same math)
# for the correctness check.
def _affine_coupling_ref(x, params):
    mask, w1, b1, w2, b2, w3, b3 = params
    x1 = x * mask
    x2 = x * (1.0 - mask)
    wdt = w1.dtype
    h = jnp.tanh(jnp.dot(x1.astype(wdt), w1,
                         preferred_element_type=jnp.float32) + b1)
    h = jnp.tanh(jnp.dot(h.astype(wdt), w2,
                         preferred_element_type=jnp.float32) + b2)
    t = jnp.dot(h.astype(wdt), w3, preferred_element_type=jnp.float32) + b3
    s = jnp.tanh(t) * 0.5 + 0.5
    z2 = x2 * jnp.exp(s) + t
    return jnp.concatenate([x1, z2], axis=1)


# ----------------------------------------------------------------------------
# RealNVP wrapper (parameter setup, split / merge glue).
# ----------------------------------------------------------------------------
class RealNVPPallas:
    def __init__(self, input_dim, hidden_dim, num_layers, key, *, tb=512,
                 weight_dtype=None):
        self.input_dim = input_dim
        self.hidden_dim = hidden_dim
        self.num_layers = num_layers
        self.tb = tb

        d = input_dim // 2
        if weight_dtype is None:
            # bf16 weights (half the HBM/VMEM bytes, bf16 MXU on v6e/v7x) only
            # pay off once the feature dims are lane-aligned / non-trivial;
            # the tiny demo weights stay f32 on the simplest lowering path.
            weight_dtype = (jnp.bfloat16
                            if (d % LANE == 0 and hidden_dim % LANE == 0)
                            else jnp.float32)
        self.weight_dtype = weight_dtype

        # Alternating binary mask over the coupling's input_dim // 2 features.
        mask = (jnp.arange(d) % 2 == 0).astype(jnp.float32).reshape(1, d)

        def linear_init(k, fan_in, fan_out):
            # torch.nn.Linear default: U(-1/sqrt(fan_in), 1/sqrt(fan_in)).
            kw, kb = jax.random.split(k)
            bound = 1.0 / float(fan_in) ** 0.5
            w = jax.random.uniform(kw, (fan_in, fan_out), jnp.float32,
                                   -bound, bound).astype(weight_dtype)
            b = jax.random.uniform(kb, (1, fan_out), jnp.float32,
                                   -bound, bound)
            return w, b

        self.layers = []
        for i in range(num_layers):
            k = jax.random.fold_in(key, i)
            k1, k2, k3 = jax.random.split(k, 3)
            w1, b1 = linear_init(k1, d, hidden_dim)
            w2, b2 = linear_init(k2, hidden_dim, hidden_dim)
            w3, b3 = linear_init(k3, hidden_dim, d)
            # log_scale_factor only feeds log_det, which RealNVP.forward
            # discards, so it is not carried into the kernel.
            self.layers.append((mask, w1, b1, w2, b2, w3, b3))

        # Deterministic stand-in for torch.randperm in RealNVP.split.
        # TODO(synk): the permutation gather and the final merge stay in plain
        # JAX (a dynamic lane gather has no cheap in-kernel form at this size).
        self.perm = jax.random.permutation(jax.random.fold_in(key, 1000),
                                           input_dim)

    def split(self, x):
        split_idx = x.shape[1] // 2
        return x[:, self.perm[:split_idx]], x[:, self.perm[split_idx:]]

    def merge(self, x1, x2):
        return jnp.concatenate([x1, x2], axis=1)

    def forward(self, x):
        x1, x2 = self.split(x)
        z1 = x1
        # TODO(synk): with num_layers == 1 (the only shape-consistent setting
        # of the reference module) there is already exactly one pallas_call,
        # so the reviewer's layer-loop fusion is moot here.
        for i in range(self.num_layers):
            z1 = affine_coupling_forward(z1, self.layers[i], tb=self.tb)
        return self.merge(z1, x2)

    def forward_ref(self, x):
        x1, x2 = self.split(x)
        z1 = x1
        for i in range(self.num_layers):
            z1 = _affine_coupling_ref(z1, self.layers[i])
        return self.merge(z1, x2)


# ----------------------------------------------------------------------------
if __name__ == "__main__":
    key = jax.random.PRNGKey(0)

    batch = 16
    input_dim = 16
    hidden_dim = 32
    num_layers = 1  # reference module is only shape-consistent for 1 layer

    model = RealNVPPallas(input_dim, hidden_dim, num_layers,
                          jax.random.fold_in(key, 7))
    x = jax.random.normal(jax.random.fold_in(key, 123),
                          (batch, input_dim), jnp.float32)

    z = jax.block_until_ready(model.forward(x))
    z_ref = model.forward_ref(x)

    assert z.shape == (batch, input_dim + input_dim // 2), z.shape
    assert bool(jnp.allclose(z, z_ref, atol=1e-4, rtol=1e-4)), "mismatch vs ref"

    print("KERNEL_OK")
</pallas_src>

<mosaic_0001>
module attributes {stable_mosaic.version = 11 : i64} {
  func.func @_affine_coupling_kernel(%arg0: i32, %arg1: memref<8x8xf32, #tpu.memory_space<vmem>>, %arg2: memref<1x8xf32, #tpu.memory_space<vmem>>, %arg3: memref<8x32xf32, #tpu.memory_space<vmem>>, %arg4: memref<1x32xf32, #tpu.memory_space<vmem>>, %arg5: memref<32x32xf32, #tpu.memory_space<vmem>>, %arg6: memref<1x32xf32, #tpu.memory_space<vmem>>, %arg7: memref<32x8xf32, #tpu.memory_space<vmem>>, %arg8: memref<1x8xf32, #tpu.memory_space<vmem>>, %arg9: memref<8x16xf32, #tpu.memory_space<vmem>>) attributes {dimension_semantics = [#tpu.dimension_semantics<parallel>], iteration_bounds = array<i64: 2>, scalar_prefetch = 0 : i64, scratch_operands = 0 : i64, tpu.core_type = #tpu.core_type<tc>, window_params = [{transform_indices = @transform_0, window_bounds = array<i64: 8, 8>}, {pipeline_mode = #tpu.pipeline_mode<synchronous>, transform_indices = @transform_1, window_bounds = array<i64: 1, 8>}, {pipeline_mode = #tpu.pipeline_mode<synchronous>, transform_indices = @transform_2, window_bounds = array<i64: 8, 32>}, {pipeline_mode = #tpu.pipeline_mode<synchronous>, transform_indices = @transform_3, window_bounds = array<i64: 1, 32>}, {pipeline_mode = #tpu.pipeline_mode<synchronous>, transform_indices = @transform_4, window_bounds = array<i64: 32, 32>}, {pipeline_mode = #tpu.pipeline_mode<synchronous>, transform_indices = @transform_5, window_bounds = array<i64: 1, 32>}, {pipeline_mode = #tpu.pipeline_mode<synchronous>, transform_indices = @transform_6, window_bounds = array<i64: 32, 8>}, {pipeline_mode = #tpu.pipeline_mode<synchronous>, transform_indices = @transform_7, window_bounds = array<i64: 1, 8>}, {transform_indices = @transform_8, window_bounds = array<i64: 8, 16>}]} {
    %c0 = arith.constant 0 : index
    %c0_0 = arith.constant 0 : index
    %0 = vector.load %arg1[%c0, %c0_0] : memref<8x8xf32, #tpu.memory_space<vmem>>, vector<8x8xf32>
    %c0_1 = arith.constant 0 : index
    %c0_2 = arith.constant 0 : index
    %1 = vector.load %arg2[%c0_1, %c0_2] : memref<1x8xf32, #tpu.memory_space<vmem>>, vector<1x8xf32>
    %2 = vector.broadcast %1 : vector<1x8xf32> to vector<8x8xf32>
    %3 = arith.mulf %0, %2 : vector<8x8xf32>
    %cst = arith.constant 1.000000e+00 : f32
    %4 = vector.broadcast %cst : f32 to vector<1x8xf32>
    %5 = arith.subf %4, %1 : vector<1x8xf32>
    %6 = vector.broadcast %5 : vector<1x8xf32> to vector<8x8xf32>
    %7 = arith.mulf %0, %6 : vector<8x8xf32>
    %c0_3 = arith.constant 0 : index
    %c0_4 = arith.constant 0 : index
    %8 = vector.load %arg3[%c0_3, %c0_4] : memref<8x32xf32, #tpu.memory_space<vmem>>, vector<8x32xf32>
    %cst_5 = arith.constant dense<0.000000e+00> : vector<8x32xf32>
    %9 = tpu.matmul %3, %8, %cst_5 {dimension_numbers = #tpu.dot_dimension_numbers<[1], [0], [0], [1], [0, 0, 1, 1], [], []>} : vector<8x8xf32>, vector<8x32xf32>, vector<8x32xf32> -> vector<8x32xf32>
    %c0_6 = arith.constant 0 : index
    %c0_7 = arith.constant 0 : index
    %10 = vector.load %arg4[%c0_6, %c0_7] : memref<1x32xf32, #tpu.memory_space<vmem>>, vector<1x32xf32>
    %11 = vector.broadcast %10 : vector<1x32xf32> to vector<8x32xf32>
    %12 = arith.addf %9, %11 : vector<8x32xf32>
    %13 = math.tanh %12 : vector<8x32xf32>
    %c0_8 = arith.constant 0 : index
    %c0_9 = arith.constant 0 : index
    %14 = vector.load %arg5[%c0_8, %c0_9] : memref<32x32xf32, #tpu.memory_space<vmem>>, vector<32x32xf32>
    %cst_10 = arith.constant dense<0.000000e+00> : vector<8x32xf32>
    %15 = tpu.matmul %13, %14, %cst_10 {dimension_numbers = #tpu.dot_dimension_numbers<[1], [0], [0], [1], [0, 0, 1, 1], [], []>} : vector<8x32xf32>, vector<32x32xf32>, vector<8x32xf32> -> vector<8x32xf32>
    %c0_11 = arith.constant 0 : index
    %c0_12 = arith.constant 0 : index
    %16 = vector.load %arg6[%c0_11, %c0_12] : memref<1x32xf32, #tpu.memory_space<vmem>>, vector<1x32xf32>
    %17 = vector.broadcast %16 : vector<1x32xf32> to vector<8x32xf32>
    %18 = arith.addf %15, %17 : vector<8x32xf32>
    %19 = math.tanh %18 : vector<8x32xf32>
    %c0_13 = arith.constant 0 : index
    %c0_14 = arith.constant 0 : index
    %20 = vector.load %arg7[%c0_13, %c0_14] : memref<32x8xf32, #tpu.memory_space<vmem>>, vector<32x8xf32>
    %cst_15 = arith.constant dense<0.000000e+00> : vector<8x8xf32>
    %21 = tpu.matmul %19, %20, %cst_15 {dimension_numbers = #tpu.dot_dimension_numbers<[1], [0], [0], [1], [0, 0, 1, 1], [], []>} : vector<8x32xf32>, vector<32x8xf32>, vector<8x8xf32> -> vector<8x8xf32>
    %c0_16 = arith.constant 0 : index
    %c0_17 = arith.constant 0 : index
    %22 = vector.load %arg8[%c0_16, %c0_17] : memref<1x8xf32, #tpu.memory_space<vmem>>, vector<1x8xf32>
    %23 = vector.broadcast %22 : vector<1x8xf32> to vector<8x8xf32>
    %24 = arith.addf %21, %23 : vector<8x8xf32>
    %25 = math.tanh %24 : vector<8x8xf32>
    %cst_18 = arith.constant 5.000000e-01 : f32
    %26 = vector.broadcast %cst_18 : f32 to vector<8x8xf32>
    %27 = arith.mulf %25, %26 : vector<8x8xf32>
    %cst_19 = arith.constant 5.000000e-01 : f32
    %28 = vector.broadcast %cst_19 : f32 to vector<8x8xf32>
    %29 = arith.addf %27, %28 : vector<8x8xf32>
    %30 = math.exp %29 : vector<8x8xf32>
    %31 = arith.mulf %7, %30 : vector<8x8xf32>
    %32 = arith.addf %31, %24 : vector<8x8xf32>
    %c0_20 = arith.constant 0 : index
    %c0_21 = arith.constant 0 : index
    %33 = vector.load %arg9[%c0_20, %c0_21] : memref<8x16xf32, #tpu.memory_space<vmem>>, vector<8x8xf32>
    tpu.vector_store %arg9[%c0_20, %c0_21], %3 {strides = array<i32>} : memref<8x16xf32, #tpu.memory_space<vmem>>, vector<8x8xf32>,
    %c0_22 = arith.constant 0 : index
    %c8 = arith.constant 8 : index
    %34 = vector.load %arg9[%c0_22, %c8] : memref<8x16xf32, #tpu.memory_space<vmem>>, vector<8x8xf32>
    tpu.vector_store %arg9[%c0_22, %c8], %32 {strides = array<i32>} : memref<8x16xf32, #tpu.memory_space<vmem>>, vector<8x8xf32>,
    return
  }
  func.func @transform_0(%arg0: i32) -> (i32, i32) {
    %c0_i32 = arith.constant 0 : i32
    %c0_i32_0 = arith.constant 0 : i32
    return %arg0, %c0_i32 : i32, i32
  }
  func.func @transform_1(%arg0: i32) -> (i32, i32) {
    %c0_i32 = arith.constant 0 : i32
    %c0_i32_0 = arith.constant 0 : i32
    %c0_i32_1 = arith.constant 0 : i32
    return %c0_i32, %c0_i32_0 : i32, i32
  }
  func.func @transform_2(%arg0: i32) -> (i32, i32) {
    %c0_i32 = arith.constant 0 : i32
    %c0_i32_0 = arith.constant 0 : i32
    %c0_i32_1 = arith.constant 0 : i32
    return %c0_i32, %c0_i32_0 : i32, i32
  }
  func.func @transform_3(%arg0: i32) -> (i32, i32) {
    %c0_i32 = arith.constant 0 : i32
    %c0_i32_0 = arith.constant 0 : i32
    %c0_i32_1 = arith.constant 0 : i32
    return %c0_i32, %c0_i32_0 : i32, i32
  }
  func.func @transform_4(%arg0: i32) -> (i32, i32) {
    %c0_i32 = arith.constant 0 : i32
    %c0_i32_0 = arith.constant 0 : i32
    %c0_i32_1 = arith.constant 0 : i32
    return %c0_i32, %c0_i32_0 : i32, i32
  }
  func.func @transform_5(%arg0: i32) -> (i32, i32) {
    %c0_i32 = arith.constant 0 : i32
    %c0_i32_0 = arith.constant 0 : i32
    %c0_i32_1 = arith.constant 0 : i32
    return %c0_i32, %c0_i32_0 : i32, i32
  }
  func.func @transform_6(%arg0: i32) -> (i32, i32) {
    %c0_i32 = arith.constant 0 : i32
    %c0_i32_0 = arith.constant 0 : i32
    %c0_i32_1 = arith.constant 0 : i32
    return %c0_i32, %c0_i32_0 : i32, i32
  }
  func.func @transform_7(%arg0: i32) -> (i32, i32) {
    %c0_i32 = arith.constant 0 : i32
    %c0_i32_0 = arith.constant 0 : i32
    %c0_i32_1 = arith.constant 0 : i32
    return %c0_i32, %c0_i32_0 : i32, i32
  }
  func.func @transform_8(%arg0: i32) -> (i32, i32) {
    %c0_i32 = arith.constant 0 : i32
    %c0_i32_0 = arith.constant 0 : i32
    return %arg0, %c0_i32 : i32, i32
  }
}

</mosaic_0001>

<bundles_post_ra>
// kernel: tpu_custom_call.1
= control target key start
LH: loop header
LB: loop body
LE: loop exit
PB: predicated region body
PF: predicated region fallthrough
CT: control target
= control target key end

     0   :  { %13 = vsyncpa [#allocation3], 0  ;;  %s1020_s0 = inlined_call_operand.vmem [shape: f32[16,8], index: 0, kind: input, shape index: {}]   ;;  %s1021_s1 = inlined_call_operand.vmem [shape: f32[1,8], index: 1, kind: input, shape index: {}]   ;;  %s1022_s2 = inlined_call_operand.vmem [shape: f32[8,32], index: 2, kind: input, shape index: {}]   ;;  %s1023_s3 = inlined_call_operand.vmem [shape: f32[1,32], index: 3, kind: input, shape index: {}]   ;;  %s1024_s4 = inlined_call_operand.vmem [shape: f32[32,32], index: 4, kind: input, shape index: {}]   ;;  %s1025_s5 = inlined_call_operand.vmem [shape: f32[1,32], index: 5, kind: input, shape index: {}]   ;;  %s1026_s6 = inlined_call_operand.vmem [shape: f32[32,8], index: 6, kind: input, shape index: {}]   ;;  %s1027_s7 = inlined_call_operand.vmem [shape: f32[1,8], index: 7, kind: input, shape index: {}]   ;;  %s1028_s8 = inlined_call_operand.hbm [shape: f32[16,16], index: 8, kind: output, shape index: {}]  }
   0x1   :  { %15 = vsyncpa [#allocation3 + $0x1], 0  ;;  %s874_s27 = smov 0   ;;  %s876_s28 = smov 0  }
   0x2   :  { %s878_s29 = smov 0   ;;  %s880_s30 = smov 0  }
   0x3 LB: > { %s895_s9 = sadd.s32 4294967295, %s823_s30   ;;  %s658_s10 = sadd.s32 4294967294, %s823_s30   ;;  %s823_s30 = sphi %s880_s30, %s1034_s30   ;;  %s819_s29 = sphi %s878_s29, %s1033_s29   ;;  %s815_s28 = sphi %s876_s28, %s1032_s28   ;;  %s811_s27 = sphi %s874_s27, %s1031_s27  }
   0x4   : > { %s899_s11 = sadd.s32 1, %s823_s30   ;;  %s201_s12 = sadd.s32 1, %s819_s29 }
   0x5   : > { %s198_s13 = ssub.s32 %s823_s30, %s899_s11  ;;  %p211_p0 = scmp.ne.s32.totalorder %s819_s29, %s815_s28 }
   0x6   : > { %p199_p1 = scmp.eq.s32.totalorder %s198_s13, 0  ;;  %p212_p2 = scmp.eq.s32.totalorder %s895_s9, 1 }
   0x7   : > { %p217_p3 = scmp.ne.s32.totalorder %s815_s28, %s811_s27  ;;  %p218_p4 = scmp.eq.s32.totalorder %s658_s10, 1 }
   0x8   : > { %s910_s14 = scalar_select %p199_p1, %s819_s29, %s201_s12  }
   0x9   : > { %p912_p5 = por %p212_p2, %p211_p0  ;;  %p916_p6 = por %p218_p4, %p217_p3 }
   0xa   : > { %p661_p7 = scmp.ge.s32.totalorder %s823_s30, 1  ;;  %p264_p8 = scmp.lt.s32.totalorder %s823_s30, 3 }
   0xc   : > { %p265_p9 = pnand %p661_p7, %p264_p8 }
   0xd   : > { %p297_p10 = scmp.lt.s32.totalorder (!%p265_p9), %s895_s9, 1  ;;  %s671_s26 = sshll.u32 (!%p265_p9), %s895_s9, 7 }
   0xe   : > { %268 = sbr.rel (%p265_p9) target bundleno = 808 (0x328), region = 52  ;;  %s985_s17 = scalar_lea.hbm (!%p265_p9), %s1028_s8, %s671_s26 }
   0xf   : > { %s828_s20 = smov (!%p265_p9), [#allocation2]  }
  0x10   : > { %s767_s21 = sshll.u32 (!%p265_p9), %s828_s20, 4  ;;  %s768_s21 = int_to_ptr.vmem [resolvable:$false] %s767_s21 }
  0x13   : > { %v318_v0 = vld [vmem:[%s1022_s2] sm:$0xff]  ;;  %v304_v1 = vlaneseq  ;;  %v825_v2 = vmov 0.0   ;;  %vm826_vm0 = vmmov 0   ;;  %s298_s19 = scalar_select %p297_p10, %s895_s9, 1  ;;  %vm326_vm1 = vcmask 64512   ;;  %v404_v9 = vld [vmem:[%s1024_s4 + $0x18] sm:$0xff] }
  0x14   : > { %686 = vmatprep.subr.mxu0 %v825_v2  ;;  %688 = vmatprep.mubr.msk.f32.mxu0 %vm826_vm0, %v825_v2  ;;  %v933_v4 = vld [vmem:[%s1021_s1] sm:$0x1]  ;;  %v403_v10 = vld [vmem:[%s1024_s4 + $0x10] sm:$0xff]  ;;  %v402_v11 = vld [vmem:[%s1024_s4 + $0x8] sm:$0xff]  ;;  %vm412_vm2 = vcmask 261120   ;;  %vm583_vm3 = vcmask 130112  }
  0x15   : > { %687 = vmatpush3.msra.mxu0 %v318_v0  ;;  %v928_v3 = vshrl.u32 %v304_v1, 7  ;;  %691 = vmatprep.subr.mxu1 %v825_v2  ;;  %s663_s22 = sshll.u32 %s298_s19, 3  ;;  %v401_v12 = vld [vmem:[%s1024_s4] sm:$0xff]  ;;  %v490_v18 = vld [vmem:[%s1026_s6 + $0x18] sm:$0xff]  ;;  %v489_v19 = vld [vmem:[%s1026_s6 + $0x10] sm:$0xff]  ;;  %v310_v35 = vsub.f32 1.0, %v933_v4 }
  0x16   : > { %699 = vmatprep.mubr.msk.f32.mxu1 %vm826_vm0, %v825_v2  ;;  %702 = vmatprep.subr.mxu0 %v825_v2  ;;  %s300_s25 = scalar_lea.vmem %s1020_s0, %s663_s22  ;;  %v664_v13 = vld [vmem:[%s1023_s3] ss:$0 sm:$0xff]  ;;  %v488_v20 = vld [vmem:[%s1026_s6 + $0x8] sm:$0xff]  ;;  %s294_s22 = sand.u32 1, %s815_s28  }
  0x17   : > { %v306_v5 = vsub.s32 0, %v928_v3  ;;  %v301_v6 = vld [vmem:[%s300_s25] sm:$0xff]  ;;  %692 = vmatpush3.msra.mxu1 %v404_v9  ;;  %s662_s23 = sshll.u32 %s294_s22, 3  ;;  %s827_s25 = smov 8  }
  0x18   : > { %693 = vmatprep.subr.mxu1 %v825_v2  ;;  %v487_v21 = vld [vmem:[%s1026_s6] sm:$0xff]  ;;  %s296_s24 = scalar_lea.vmem [#allocation2], %s662_s23  ;;  %s586_s18 = scalar_lea.sflag [#allocation3], %s294_s22 }
  0x19   : > { %v307_v7 = vrot.slane %v933_v4, %v306_v5  ;;  %694 = vmatpush3.msra.mxu1 %v403_v10  ;;  %v666_v22 = vld [vmem:[%s1025_s5] ss:$0 sm:$0xff]  ;;  %v315_v36 = vrot.slane %v310_v35, %v306_v5  ;;  %s599_s10 = sshll.u32 %s296_s24, 4  ;;  %s769_s9 = scalar_lea.vmem %s768_s21, 256  ;;  %s600_s10 = int_to_ptr.vmem [resolvable:$true] %s599_s10 }
  0x1a   : > { %695 = vmatprep.subr.mxu1 %v825_v2  ;;  %v668_v27 = vld [vmem:[%s1027_s7] ss:$0 sm:$0xff]  ;;  %s763_s19 = scalar_lea.vmem %s600_s10, 128  ;;  %p770_p0 = scmp.lt.s32.totalorder %s600_s10, %s768_s21 }
  0x1b   : > { %v309_v8 = vmul.f32 %v307_v7, %v301_v6  ;;  %696 = vmatpush3.msra.mxu1 %v402_v11  ;;  %v317_v37 = vmul.f32 %v315_v36, %v301_v6  ;;  %p764_p11 = scmp.ne.s32.totalorder %s600_s10, %s763_s19  ;;  %p771_p1 = scmp.lt.s32.totalorder %s769_s9, %s763_s19 }
  0x1c   : > { %697 = vmatprep.subr.mxu1 %v825_v2 }
  0x1d   : > { %689 = vmatmul.mubr.msk.f32.vlgmr.msra.gmra.mxu0 %vm326_vm1, %v309_v8  ;;  %698 = vmatpush3.msra.mxu1 %v401_v12  ;;  %578 = vst.msk [vmem:[%s296_s24] sm:$0xff] %vm326_vm1, %v309_v8  ;;  %p765_p12 = pnand %p764_p11, %p912_p5  ;;  %p772_p2 = por %p771_p1, %p770_p0 }
  0x1e   : > { %710 = vmatprep.mubr.msk.f32.mxu0 %vm826_vm0, %v825_v2  ;;  %703 = vmatpush3.msra.mxu0 %v490_v18 }
  0x1f   : > { %704 = vmatprep.subr.mxu0 %v825_v2  ;;  %p766_p13 = pneg %p765_p12 }
  0x20   : > { %705 = vmatpush3.msra.mxu0 %v489_v19 }
  0x21   : > { %706 = vmatprep.subr.mxu0 %v825_v2  ;;  %p773_p3 = pnand %p772_p2, %p766_p13 }
  0x22   : > { %707 = vmatpush3.msra.mxu0 %v488_v20 }
  0x23   : > { %708 = vmatprep.subr.mxu0 %v825_v2 }
  0x24   : > { %709 = vmatpush3.msra.mxu0 %v487_v21 }
  0xdd   : > { %v396_v14 = vpop.f32.mrf.mxu0 }
  0xde   : > { %v397_v15 = vadd.f32 %v664_v13, %v396_v14 }
  0xdf   : > { %v690_v16 = vpop.f32.mrf.mxu0 }
  0xe0   : > { %755 = vtanh.f32 %v397_v15 }
  0xed   : > { %v756_v17 = vpop.eup %755 }
  0xee   : > { %700 = vmatmul.mubr.msk.f32.vlgmr.msra.gmra.mxu1 %vm412_vm2, %v756_v17 }
 0x1ae   : > { %v482_v23 = vpop.f32.mrf.mxu1 }
 0x1af   : > { %v483_v24 = vadd.f32 %v666_v22, %v482_v23 }
 0x1b0   : > { %v701_v25 = vpop.f32.mrf.mxu1 }
 0x1b1   : > { %757 = vtanh.f32 %v483_v24 }
 0x1be   : > { %v758_v26 = vpop.eup %757 }
 0x1bf   : > { %711 = vmatmul.mubr.msk.f32.vlgmr.msra.gmra.mxu0 %vm412_vm2, %v758_v26 }
 0x27f   : > { %v567_v28 = vpop.f32.mrf.mxu0 }
 0x280   : > { %v568_v29 = vadd.f32 %v668_v27, %v567_v28 }
 0x281   : > { %v712_v30 = vpop.f32.mrf.mxu0 }
 0x282   : > { %759 = vtanh.f32 %v568_v29 }
 0x28f   : > { %v760_v31 = vpop.eup %759 }
 0x290   : > { %v572_v32 = vmul.f32 0.5, %v760_v31 }
 0x292   : > { %v573_v33 = vadd.f32 0.5, %v572_v32 }
 0x294   : > { %v574_v34 = vmul.f32 1.442695, %v573_v33 }
 0x296   : > { %761 = vpow2.f32 %v574_v34 }
 0x2a3   : > { %v762_v38 = vpop.eup %761 }
 0x2a4   : > { %v576_v39 = vmul.f32 %v762_v38, %v317_v37 }
 0x2a6   : > { %v577_v40 = vadd.f32 %v576_v39, %v568_v29 }
 0x2a8   : > { %580 = vrot.lane.b32.xlu0 %v577_v40, %s827_s25 }
 0x31a   : > { %v581_v41 = vpop.permute.xlu0 %580 }
 0x31b   : > { %584 = vst.msk [vmem:[%s296_s24] sm:$0xff] %vm583_vm3, %v581_v41 }
 0x31c   : > { %776 = shalt.err (!%p773_p3)
}
 0x31d   : > { %s777_s23 = scalar_lea.hbm %s985_s17, 128  ;;  %s781_s25 = scalar_lea.hbm %s1028_s8, 256 }
 0x31e   : > { %p778_p4 = scmp.ne.s32.totalorder %s985_s17, %s777_s23  ;;  %p782_p9 = scmp.lt.s32.totalorder %s985_s17, %s1028_s8 }
 0x31f   : > { %p783_p10 = scmp.lt.s32.totalorder %s781_s25, %s777_s23 }
 0x320   : > { %p779_p7 = pnand %p778_p4, %p912_p5 }
 0x321   : > { %p784_p11 = por %p783_p10, %p782_p9 }
 0x322   : > { %p780_p8 = pneg %p779_p7 }
 0x324   : > { %p785_p12 = pnand %p784_p11, %p780_p8 }
 0x326   : > { %788 = shalt.err (!%p785_p12)
}
 0x327   : > { %713 = dma.vmem_to_hbm [thread:$0]  (%p912_p5), %s600_s10, 128, %s985_s17, %s586_s18  }
 0x328 PF: > { %p719_p13 = scmp.ge.s32.totalorder %s823_s30, 2  ;;  %s611_s13 = sand.u32 1, %s811_s27  }
 0x329   : > { %s612_s19 = scalar_lea.sflag [#allocation3], %s611_s13 }
 0x32a   : > { %p716_p0 = pnand %p719_p13, %p916_p6 }
 0x32c   : > { %p717_p1 = pneg %p716_p0 }
 0x32e   : > { %806 = dma.done.wait (%p717_p1), %s612_s19, 128  }
 0x32f   : > { %808 = vsyncadd (%p717_p1), %s612_s19, 4294967168  ;;  %p18_p2 = scmp.ge.s32.totalorder %s899_s11, 4   ;;  %s1031_s27 = smov %s815_s28 }
 0x330   : > { %s1032_s28 = smov %s819_s29  ;;  %s1033_s29 = smov %s910_s14 }
 0x331   : > { %s1034_s30 = smov %s899_s11  ;;  %20 = sbr.rel (!%p18_p2) target bundleno = 3 (0x3), region = 87 }
 0x336   :  { %617 = vsyncpa [#allocation3], 1 }
 0x337   :  { %619 = vsyncpa [#allocation3 + $0x1], 1 }

</bundles_post_ra>
